<compile_context>
chip_gen: v7x
topology: tpu7x:2x2x1
jax: 0.10.0
libtpu: 0.0.40
codegen_flags: <defaults>
</compile_context>

<pallas_src>
import functools
import math

import jax
import jax.numpy as jnp
from jax import lax
from jax.experimental import pallas as pl
from jax.experimental.pallas import tpu as pltpu


_GELU_C = math.sqrt(2.0 / math.pi)


def _gelu_tanh(x):
    # GELU with tanh approximation, matching torch.nn.GELU(approximate='tanh')
    return 0.5 * x * (1.0 + jnp.tanh(_GELU_C * (x + 0.044715 * x * x * x)))


def _round_up(v, m):
    return ((v + m - 1) // m) * m


def _pick_hidden_block(H, pref=512):
    """Largest multiple of 128 that divides H and is <= pref (else H)."""
    if H <= pref or H % 128 != 0:
        return H
    t = (pref // 128) * 128
    while t >= 128:
        if H % t == 0:
            return t
        t -= 128
    return H


def _vmem_capacity_bytes():
    try:
        info = pltpu.get_tpu_info()
        cap = getattr(info, "vmem_capacity_bytes", None)
        if cap:
            return int(cap)
    except Exception:
        pass
    try:
        if "v7" in jax.devices()[0].device_kind.lower():
            return 64 * 1024 * 1024
    except Exception:
        pass
    return 128 * 1024 * 1024


def _gelu_dtype_for_device():
    # v6e/v7x have bf16 VALU/EUP (packed vregs, ~2x throughput, half the
    # spilled-intermediate bytes); v5e and older do not -> keep f32 there.
    try:
        kind = jax.devices()[0].device_kind.lower()
    except Exception:
        return jnp.float32
    if "v6" in kind or "v7" in kind:
        return jnp.bfloat16
    return jnp.float32


def _mlp_kernel(x_ref, w_fc_ref, b_fc_ref, w_proj_ref, b_proj_ref, o_ref,
                acc_ref, *, gelu_dtype):
    """One token tile of the MLP.

    x_ref:      [TM, C]            activations (input dtype; cast in-kernel)
    w_fc_ref:   [n_chunks, C, TH]  c_fc weight, chunked along the hidden axis
    b_fc_ref:   [n_chunks, 1, TH]  c_fc bias (f32)
    w_proj_ref: [n_chunks, TH, C]  c_proj weight, chunked along the hidden axis
    b_proj_ref: [1, C]             c_proj bias (f32)
    o_ref:      [TM, C]            output
    acc_ref:    [TM, C] f32        VMEM accumulator for the second matmul
    """
    compute_dtype = w_fc_ref.dtype
    x = x_ref[...].astype(compute_dtype)   # in-kernel cast: no extra HBM pass
    n_chunks = w_fc_ref.shape[0]

    acc_ref[...] = jnp.zeros_like(acc_ref)

    def body(j, carry):
        # c_fc chunk: [TM, C] @ [C, TH] -> [TM, TH], f32 accumulation on MXU.
        h = jnp.dot(x, w_fc_ref[j], preferred_element_type=jnp.float32)
        h = (h + b_fc_ref[j]).astype(gelu_dtype)
        h = _gelu_tanh(h)
        # c_proj chunk: accumulate into the single f32 accumulator so the MXU
        # result path (MRB on v7x) can accumulate in place.
        acc_ref[...] += jnp.dot(h.astype(compute_dtype), w_proj_ref[j],
                                preferred_element_type=jnp.float32)
        return carry

    lax.fori_loop(0, n_chunks, body, 0, unroll=True)
    o_ref[...] = (acc_ref[...] + b_proj_ref[...]).astype(o_ref.dtype)


def prepare_mlp_params(w_fc, b_fc, w_proj, b_proj, *,
                       compute_dtype=jnp.bfloat16, hidden_block=512):
    """One-time (outside the hot path) cast + hidden-axis chunking of weights."""
    C, H = w_fc.shape
    assert w_proj.shape == (H, C)
    th = _pick_hidden_block(H, hidden_block)
    n_chunks = H // th
    w_fc_c = jnp.transpose(
        w_fc.astype(compute_dtype).reshape(C, n_chunks, th), (1, 0, 2))
    b_fc_c = b_fc.astype(jnp.float32).reshape(n_chunks, 1, th)
    w_proj_c = w_proj.astype(compute_dtype).reshape(n_chunks, th, C)
    b_proj_c = b_proj.astype(jnp.float32).reshape(1, C)
    return {
        "w_fc": w_fc_c, "b_fc": b_fc_c, "w_proj": w_proj_c, "b_proj": b_proj_c,
        "C": C, "H": H, "th": th, "n_chunks": n_chunks,
        "compute_dtype": jnp.dtype(compute_dtype),
    }


def mlp_forward(x, params, *, block_tokens=None):
    """x: [B, T, C] -> [B, T, C] using prepared params (prepare_mlp_params)."""
    B, T, C = x.shape
    assert C == params["C"]
    H, th, n_chunks = params["H"], params["th"], params["n_chunks"]
    w_fc_c, b_fc_c = params["w_fc"], params["b_fc"]
    w_proj_c, b_proj_c = params["w_proj"], params["b_proj"]
    cdt = params["compute_dtype"].itemsize

    N = B * T
    out_dtype = x.dtype
    x_it = jnp.dtype(x.dtype).itemsize
    odt = jnp.dtype(out_dtype).itemsize

    gelu_dtype = _gelu_dtype_for_device()

    # Token tile: multiple of 16 sublanes (bf16 packing). Larger tiles amortize
    # per-grid-step overhead now that the hidden axis is chunked in-kernel.
    if block_tokens is None:
        block_tokens = 512 if C <= 1024 else 256
    tm = min(block_tokens, _round_up(N, 16))
    tm = _round_up(tm, 16)

    vmem_limit = int(0.85 * _vmem_capacity_bytes())

    def est_vmem(tm_, single_buffer=True):
        w_bytes = (2 * C * H) * cdt + (H + C) * 4
        return ((1 if single_buffer else 2) * w_bytes  # resident weights/biases
                + 2 * tm_ * C * x_it                   # x tile, double-buffered
                + 2 * tm_ * C * odt                    # out tile, double-buffered
                + tm_ * C * 4                          # f32 accumulator scratch
                + 2 * tm_ * th * 4)                    # live h chunk + headroom

    # Shrink the token tile if the footprint would not fit under the limit.
    while tm > 16 and est_vmem(tm) > vmem_limit:
        tm = max(16, _round_up(tm // 2, 16))
    # TODO(synk): if the single-buffered weights alone exceed VMEM (very large C,
    # esp. v7x's 64 MiB/TC), stream weight tiles over an H grid axis with
    # tm >= 512 to stay above the HBM roofline instead of holding them resident.

    grid = (pl.cdiv(N, tm),)        # ragged last block handled by Pallas masking
    x2d = x.reshape(N, C)           # metadata-only; bf16 cast happens in-kernel

    cost = pl.CostEstimate(
        flops=4 * N * C * H,                 # two matmuls: 2*N*C*H each
        transcendentals=N * H,               # one tanh per hidden element
        bytes_accessed=(N * C * (x_it + odt) # activations in/out
                        + 2 * C * H * cdt    # both weight matrices (per TC)
                        + (H + C) * 4),      # biases
    )

    kernel = functools.partial(_mlp_kernel, gelu_dtype=gelu_dtype)

    def run(single_buffer):
        # Grid-invariant operands (constant index_map) gain nothing from the
        # default double-buffering; request a single VMEM buffer for them.
        wkw = {"pipeline_mode": pl.Buffered(1)} if single_buffer else {}
        return pl.pallas_call(
            kernel,
            out_shape=jax.ShapeDtypeStruct((N, C), out_dtype),
            grid_spec=pltpu.PrefetchScalarGridSpec(
                num_scalar_prefetch=0,
                grid=grid,
                in_specs=[
                    pl.BlockSpec((tm, C), lambda i: (i, 0)),             # x streams
                    pl.BlockSpec((n_chunks, C, th), lambda i: (0, 0, 0), **wkw),
                    pl.BlockSpec((n_chunks, 1, th), lambda i: (0, 0, 0), **wkw),
                    pl.BlockSpec((n_chunks, th, C), lambda i: (0, 0, 0), **wkw),
                    pl.BlockSpec((1, C), lambda i: (0, 0), **wkw),
                ],
                out_specs=pl.BlockSpec((tm, C), lambda i: (i, 0)),
                scratch_shapes=[pltpu.VMEM((tm, C), jnp.float32)],
            ),
            compiler_params=pltpu.CompilerParams(
                dimension_semantics=("parallel",),
                vmem_limit_bytes=vmem_limit,
            ),
            cost_estimate=cost,
        )(x2d, w_fc_c, b_fc_c, w_proj_c, b_proj_c)

    try:
        out2d = run(single_buffer=True)
    except Exception:
        # Fallback for Pallas versions without per-BlockSpec pipeline_mode.
        out2d = run(single_buffer=False)

    return out2d.reshape(B, T, C)


def reference_mlp(x, w_fc, b_fc, w_proj, b_proj):
    h = jnp.einsum("btc,ch->bth", x, w_fc) + b_fc
    h = _gelu_tanh(h)
    return jnp.einsum("bth,hc->btc", h, w_proj) + b_proj


if __name__ == "__main__":
    # Small GPT-2-style config: batch=2, seq=8, n_embd=32 -> hidden=128.
    B, T, C = 2, 8, 32
    H = 4 * C

    key = jax.random.PRNGKey(0)
    kx, kwf, kbf, kwp, kbp = jax.random.split(key, 5)

    x = jax.random.normal(kx, (B, T, C), dtype=jnp.float32)
    # Weights stored as [in_features, out_features] (PyTorch nn.Linear weight.T).
    w_fc = jax.random.normal(kwf, (C, H), dtype=jnp.float32) * 0.02
    b_fc = jax.random.normal(kbf, (H,), dtype=jnp.float32) * 0.02
    w_proj = jax.random.normal(kwp, (H, C), dtype=jnp.float32) * (
        0.02 / math.sqrt(2.0))   # NANOGPT_SCALE_INIT-style scaling
    b_proj = jax.random.normal(kbp, (C,), dtype=jnp.float32) * 0.02

    # One-time weight preparation (bf16 cast + hidden-axis chunking),
    # outside the per-step hot path.
    params = prepare_mlp_params(w_fc, b_fc, w_proj, b_proj)

    out = mlp_forward(x, params)
    out = jax.block_until_ready(out)

    ref = reference_mlp(x, w_fc, b_fc, w_proj, b_proj)
    assert out.shape == (B, T, C)
    err = jnp.max(jnp.abs(out - ref))
    # bf16 MXU inputs (and bf16 GELU on v6e/v7x) with f32 accumulation
    # -> loosened tolerance vs the f32 reference.
    assert jnp.allclose(out, ref, atol=2e-2, rtol=2e-2), f"max err {err}"

    print("KERNEL_OK")
</pallas_src>

<mosaic_0001>
module attributes {stable_mosaic.version = 11 : i64} {
  func.func @_mlp_kernel(%arg0: i32, %arg1: memref<16x32xf32, #tpu.memory_space<vmem>>, %arg2: memref<1x32x128xbf16, #tpu.memory_space<vmem>>, %arg3: memref<1x1x128xf32, #tpu.memory_space<vmem>>, %arg4: memref<1x128x32xbf16, #tpu.memory_space<vmem>>, %arg5: memref<1x32xf32, #tpu.memory_space<vmem>>, %arg6: memref<16x32xf32, #tpu.memory_space<vmem>>, %arg7: memref<16x32xf32, #tpu.memory_space<vmem>>) attributes {dimension_semantics = [#tpu.dimension_semantics<parallel>], iteration_bounds = array<i64: 1>, scalar_prefetch = 0 : i64, scratch_operands = 1 : i64, tpu.core_type = #tpu.core_type<tc>, window_params = [{transform_indices = @transform_0, window_bounds = array<i64: 16, 32>}, {pipeline_mode = #tpu.pipeline_mode<synchronous>, transform_indices = @transform_1, window_bounds = array<i64: 1, 32, 128>}, {pipeline_mode = #tpu.pipeline_mode<synchronous>, transform_indices = @transform_2, window_bounds = array<i64: 1, 1, 128>}, {pipeline_mode = #tpu.pipeline_mode<synchronous>, transform_indices = @transform_3, window_bounds = array<i64: 1, 128, 32>}, {pipeline_mode = #tpu.pipeline_mode<synchronous>, transform_indices = @transform_4, window_bounds = array<i64: 1, 32>}, {transform_indices = @transform_5, window_bounds = array<i64: 16, 32>}]} {
    %c0 = arith.constant 0 : index
    %c0_0 = arith.constant 0 : index
    %0 = vector.load %arg1[%c0, %c0_0] : memref<16x32xf32, #tpu.memory_space<vmem>>, vector<16x32xf32>
    %1 = arith.truncf %0 : vector<16x32xf32> to vector<16x32xbf16>
    %cst = arith.constant 0.000000e+00 : f32
    %2 = vector.broadcast %cst : f32 to vector<16x32xf32>
    %c0_1 = arith.constant 0 : index
    %c0_2 = arith.constant 0 : index
    %3 = vector.load %arg7[%c0_1, %c0_2] : memref<16x32xf32, #tpu.memory_space<vmem>>, vector<16x32xf32>
    tpu.vector_store %arg7[%c0_1, %c0_2], %2 {strides = array<i32>} : memref<16x32xf32, #tpu.memory_space<vmem>>, vector<16x32xf32>,
    %c0_i32 = arith.constant 0 : i32
    %4 = arith.index_cast %c0_i32 : i32 to index
    %c0_3 = arith.constant 0 : index
    %c0_4 = arith.constant 0 : index
    %5 = vector.load %arg2[%4, %c0_3, %c0_4] : memref<1x32x128xbf16, #tpu.memory_space<vmem>>, vector<1x32x128xbf16>
    %6 = vector.shape_cast %5 : vector<1x32x128xbf16> to vector<32x128xbf16>
    %cst_5 = arith.constant dense<0.000000e+00> : vector<16x128xf32>
    %7 = tpu.matmul %1, %6, %cst_5 {dimension_numbers = #tpu.dot_dimension_numbers<[1], [0], [0], [1], [0, 0, 1, 1], [], []>} : vector<16x32xbf16>, vector<32x128xbf16>, vector<16x128xf32> -> vector<16x128xf32>
    %8 = arith.index_cast %c0_i32 : i32 to index
    %c0_6 = arith.constant 0 : index
    %c0_7 = arith.constant 0 : index
    %9 = vector.load %arg3[%8, %c0_6, %c0_7] : memref<1x1x128xf32, #tpu.memory_space<vmem>>, vector<1x1x128xf32>
    %10 = vector.shape_cast %9 : vector<1x1x128xf32> to vector<1x128xf32>
    %11 = vector.broadcast %10 : vector<1x128xf32> to vector<16x128xf32>
    %12 = arith.addf %7, %11 : vector<16x128xf32>
    %cst_8 = arith.constant 5.000000e-01 : f32
    %13 = vector.broadcast %cst_8 : f32 to vector<16x128xf32>
    %14 = arith.mulf %13, %12 : vector<16x128xf32>
    %cst_9 = arith.constant 4.471500e-02 : f32
    %15 = vector.broadcast %cst_9 : f32 to vector<16x128xf32>
    %16 = arith.mulf %15, %12 : vector<16x128xf32>
    %17 = arith.mulf %16, %12 : vector<16x128xf32>
    %18 = arith.mulf %17, %12 : vector<16x128xf32>
    %19 = arith.addf %12, %18 : vector<16x128xf32>
    %cst_10 = arith.constant 0.797884583 : f32
    %20 = vector.broadcast %cst_10 : f32 to vector<16x128xf32>
    %21 = arith.mulf %20, %19 : vector<16x128xf32>
    %22 = math.tanh %21 : vector<16x128xf32>
    %cst_11 = arith.constant 1.000000e+00 : f32
    %23 = vector.broadcast %cst_11 : f32 to vector<16x128xf32>
    %24 = arith.addf %23, %22 : vector<16x128xf32>
    %25 = arith.mulf %14, %24 : vector<16x128xf32>
    %c0_12 = arith.constant 0 : index
    %c0_13 = arith.constant 0 : index
    %26 = vector.load %arg7[%c0_12, %c0_13] : memref<16x32xf32, #tpu.memory_space<vmem>>, vector<16x32xf32>
    %27 = arith.truncf %25 : vector<16x128xf32> to vector<16x128xbf16>
    %28 = arith.index_cast %c0_i32 : i32 to index
    %c0_14 = arith.constant 0 : index
    %c0_15 = arith.constant 0 : index
    %29 = vector.load %arg4[%28, %c0_14, %c0_15] : memref<1x128x32xbf16, #tpu.memory_space<vmem>>, vector<1x128x32xbf16>
    %30 = vector.shape_cast %29 : vector<1x128x32xbf16> to vector<128x32xbf16>
    %cst_16 = arith.constant dense<0.000000e+00> : vector<16x32xf32>
    %31 = tpu.matmul %27, %30, %cst_16 {dimension_numbers = #tpu.dot_dimension_numbers<[1], [0], [0], [1], [0, 0, 1, 1], [], []>} : vector<16x128xbf16>, vector<128x32xbf16>, vector<16x32xf32> -> vector<16x32xf32>
    %32 = arith.addf %26, %31 : vector<16x32xf32>
    %c0_17 = arith.constant 0 : index
    %c0_18 = arith.constant 0 : index
    %33 = vector.load %arg7[%c0_17, %c0_18] : memref<16x32xf32, #tpu.memory_space<vmem>>, vector<16x32xf32>
    tpu.vector_store %arg7[%c0_17, %c0_18], %32 {strides = array<i32>} : memref<16x32xf32, #tpu.memory_space<vmem>>, vector<16x32xf32>,
    %c1_i32 = arith.constant 1 : i32
    %c0_19 = arith.constant 0 : index
    %c0_20 = arith.constant 0 : index
    %34 = vector.load %arg7[%c0_19, %c0_20] : memref<16x32xf32, #tpu.memory_space<vmem>>, vector<16x32xf32>
    %c0_21 = arith.constant 0 : index
    %c0_22 = arith.constant 0 : index
    %35 = vector.load %arg5[%c0_21, %c0_22] : memref<1x32xf32, #tpu.memory_space<vmem>>, vector<1x32xf32>
    %36 = vector.broadcast %35 : vector<1x32xf32> to vector<16x32xf32>
    %37 = arith.addf %34, %36 : vector<16x32xf32>
    %c0_23 = arith.constant 0 : index
    %c0_24 = arith.constant 0 : index
    %38 = vector.load %arg6[%c0_23, %c0_24] : memref<16x32xf32, #tpu.memory_space<vmem>>, vector<16x32xf32>
    tpu.vector_store %arg6[%c0_23, %c0_24], %37 {strides = array<i32>} : memref<16x32xf32, #tpu.memory_space<vmem>>, vector<16x32xf32>,
    return
  }
  func.func @transform_0(%arg0: i32) -> (i32, i32) {
    %c0_i32 = arith.constant 0 : i32
    %c0_i32_0 = arith.constant 0 : i32
    return %arg0, %c0_i32 : i32, i32
  }
  func.func @transform_1(%arg0: i32) -> (i32, i32, i32) {
    %c0_i32 = arith.constant 0 : i32
    %c0_i32_0 = arith.constant 0 : i32
    %c0_i32_1 = arith.constant 0 : i32
    %c0_i32_2 = arith.constant 0 : i32
    return %c0_i32, %c0_i32_0, %c0_i32_1 : i32, i32, i32
  }
  func.func @transform_2(%arg0: i32) -> (i32, i32, i32) {
    %c0_i32 = arith.constant 0 : i32
    %c0_i32_0 = arith.constant 0 : i32
    %c0_i32_1 = arith.constant 0 : i32
    %c0_i32_2 = arith.constant 0 : i32
    return %c0_i32, %c0_i32_0, %c0_i32_1 : i32, i32, i32
  }
  func.func @transform_3(%arg0: i32) -> (i32, i32, i32) {
    %c0_i32 = arith.constant 0 : i32
    %c0_i32_0 = arith.constant 0 : i32
    %c0_i32_1 = arith.constant 0 : i32
    %c0_i32_2 = arith.constant 0 : i32
    return %c0_i32, %c0_i32_0, %c0_i32_1 : i32, i32, i32
  }
  func.func @transform_4(%arg0: i32) -> (i32, i32) {
    %c0_i32 = arith.constant 0 : i32
    %c0_i32_0 = arith.constant 0 : i32
    %c0_i32_1 = arith.constant 0 : i32
    return %c0_i32, %c0_i32_0 : i32, i32
  }
  func.func @transform_5(%arg0: i32) -> (i32, i32) {
    %c0_i32 = arith.constant 0 : i32
    %c0_i32_0 = arith.constant 0 : i32
    return %arg0, %c0_i32 : i32, i32
  }
}

module attributes {stable_mosaic.version = 11 : i64} {
  func.func @_mlp_kernel(%arg0: i32, %arg1: memref<16x32xf32, #tpu.memory_space<vmem>>, %arg2: memref<1x32x128xbf16, #tpu.memory_space<vmem>>, %arg3: memref<1x1x128xf32, #tpu.memory_space<vmem>>, %arg4: memref<1x128x32xbf16, #tpu.memory_space<vmem>>, %arg5: memref<1x32xf32, #tpu.memory_space<vmem>>, %arg6: memref<16x32xf32, #tpu.memory_space<vmem>>, %arg7: memref<16x32xf32, #tpu.memory_space<vmem>>) attributes {dimension_semantics = [#tpu.dimension_semantics<parallel>], iteration_bounds = array<i64: 1>, scalar_prefetch = 0 : i64, scratch_operands = 1 : i64, tpu.core_type = #tpu.core_type<tc>, window_params = [{transform_indices = @transform_0, window_bounds = array<i64: 16, 32>}, {pipeline_mode = #tpu.pipeline_mode<synchronous>, transform_indices = @transform_1, window_bounds = array<i64: 1, 32, 128>}, {pipeline_mode = #tpu.pipeline_mode<synchronous>, transform_indices = @transform_2, window_bounds = array<i64: 1, 1, 128>}, {pipeline_mode = #tpu.pipeline_mode<synchronous>, transform_indices = @transform_3, window_bounds = array<i64: 1, 128, 32>}, {pipeline_mode = #tpu.pipeline_mode<synchronous>, transform_indices = @transform_4, window_bounds = array<i64: 1, 32>}, {transform_indices = @transform_5, window_bounds = array<i64: 16, 32>}]} {
    %c0 = arith.constant 0 : index
    %c0_0 = arith.constant 0 : index
    %0 = vector.load %arg1[%c0, %c0_0] : memref<16x32xf32, #tpu.memory_space<vmem>>, vector<16x32xf32>
    %1 = arith.truncf %0 : vector<16x32xf32> to vector<16x32xbf16>
    %cst = arith.constant 0.000000e+00 : f32
    %2 = vector.broadcast %cst : f32 to vector<16x32xf32>
    %c0_1 = arith.constant 0 : index
    %c0_2 = arith.constant 0 : index
    %3 = vector.load %arg7[%c0_1, %c0_2] : memref<16x32xf32, #tpu.memory_space<vmem>>, vector<16x32xf32>
    tpu.vector_store %arg7[%c0_1, %c0_2], %2 {strides = array<i32>} : memref<16x32xf32, #tpu.memory_space<vmem>>, vector<16x32xf32>,
    %c0_i32 = arith.constant 0 : i32
    %4 = arith.index_cast %c0_i32 : i32 to index
    %c0_3 = arith.constant 0 : index
    %c0_4 = arith.constant 0 : index
    %5 = vector.load %arg2[%4, %c0_3, %c0_4] : memref<1x32x128xbf16, #tpu.memory_space<vmem>>, vector<1x32x128xbf16>
    %6 = vector.shape_cast %5 : vector<1x32x128xbf16> to vector<32x128xbf16>
    %cst_5 = arith.constant dense<0.000000e+00> : vector<16x128xf32>
    %7 = tpu.matmul %1, %6, %cst_5 {dimension_numbers = #tpu.dot_dimension_numbers<[1], [0], [0], [1], [0, 0, 1, 1], [], []>} : vector<16x32xbf16>, vector<32x128xbf16>, vector<16x128xf32> -> vector<16x128xf32>
    %8 = arith.index_cast %c0_i32 : i32 to index
    %c0_6 = arith.constant 0 : index
    %c0_7 = arith.constant 0 : index
    %9 = vector.load %arg3[%8, %c0_6, %c0_7] : memref<1x1x128xf32, #tpu.memory_space<vmem>>, vector<1x1x128xf32>
    %10 = vector.shape_cast %9 : vector<1x1x128xf32> to vector<1x128xf32>
    %11 = vector.broadcast %10 : vector<1x128xf32> to vector<16x128xf32>
    %12 = arith.addf %7, %11 : vector<16x128xf32>
    %cst_8 = arith.constant 5.000000e-01 : f32
    %13 = vector.broadcast %cst_8 : f32 to vector<16x128xf32>
    %14 = arith.mulf %13, %12 : vector<16x128xf32>
    %cst_9 = arith.constant 4.471500e-02 : f32
    %15 = vector.broadcast %cst_9 : f32 to vector<16x128xf32>
    %16 = arith.mulf %15, %12 : vector<16x128xf32>
    %17 = arith.mulf %16, %12 : vector<16x128xf32>
    %18 = arith.mulf %17, %12 : vector<16x128xf32>
    %19 = arith.addf %12, %18 : vector<16x128xf32>
    %cst_10 = arith.constant 0.797884583 : f32
    %20 = vector.broadcast %cst_10 : f32 to vector<16x128xf32>
    %21 = arith.mulf %20, %19 : vector<16x128xf32>
    %22 = math.tanh %21 : vector<16x128xf32>
    %cst_11 = arith.constant 1.000000e+00 : f32
    %23 = vector.broadcast %cst_11 : f32 to vector<16x128xf32>
    %24 = arith.addf %23, %22 : vector<16x128xf32>
    %25 = arith.mulf %14, %24 : vector<16x128xf32>
    %c0_12 = arith.constant 0 : index
    %c0_13 = arith.constant 0 : index
    %26 = vector.load %arg7[%c0_12, %c0_13] : memref<16x32xf32, #tpu.memory_space<vmem>>, vector<16x32xf32>
    %27 = arith.truncf %25 : vector<16x128xf32> to vector<16x128xbf16>
    %28 = arith.index_cast %c0_i32 : i32 to index
    %c0_14 = arith.constant 0 : index
    %c0_15 = arith.constant 0 : index
    %29 = vector.load %arg4[%28, %c0_14, %c0_15] : memref<1x128x32xbf16, #tpu.memory_space<vmem>>, vector<1x128x32xbf16>
    %30 = vector.shape_cast %29 : vector<1x128x32xbf16> to vector<128x32xbf16>
    %cst_16 = arith.constant dense<0.000000e+00> : vector<16x32xf32>
    %31 = tpu.matmul %27, %30, %cst_16 {dimension_numbers = #tpu.dot_dimension_numbers<[1], [0], [0], [1], [0, 0, 1, 1], [], []>} : vector<16x128xbf16>, vector<128x32xbf16>, vector<16x32xf32> -> vector<16x32xf32>
    %32 = arith.addf %26, %31 : vector<16x32xf32>
    %c0_17 = arith.constant 0 : index
    %c0_18 = arith.constant 0 : index
    %33 = vector.load %arg7[%c0_17, %c0_18] : memref<16x32xf32, #tpu.memory_space<vmem>>, vector<16x32xf32>
    tpu.vector_store %arg7[%c0_17, %c0_18], %32 {strides = array<i32>} : memref<16x32xf32, #tpu.memory_space<vmem>>, vector<16x32xf32>,
    %c1_i32 = arith.constant 1 : i32
    %c0_19 = arith.constant 0 : index
    %c0_20 = arith.constant 0 : index
    %34 = vector.load %arg7[%c0_19, %c0_20] : memref<16x32xf32, #tpu.memory_space<vmem>>, vector<16x32xf32>
    %c0_21 = arith.constant 0 : index
    %c0_22 = arith.constant 0 : index
    %35 = vector.load %arg5[%c0_21, %c0_22] : memref<1x32xf32, #tpu.memory_space<vmem>>, vector<1x32xf32>
    %36 = vector.broadcast %35 : vector<1x32xf32> to vector<16x32xf32>
    %37 = arith.addf %34, %36 : vector<16x32xf32>
    %c0_23 = arith.constant 0 : index
    %c0_24 = arith.constant 0 : index
    %38 = vector.load %arg6[%c0_23, %c0_24] : memref<16x32xf32, #tpu.memory_space<vmem>>, vector<16x32xf32>
    tpu.vector_store %arg6[%c0_23, %c0_24], %37 {strides = array<i32>} : memref<16x32xf32, #tpu.memory_space<vmem>>, vector<16x32xf32>,
    return
  }
  func.func @transform_0(%arg0: i32) -> (i32, i32) {
    %c0_i32 = arith.constant 0 : i32
    %c0_i32_0 = arith.constant 0 : i32
    return %arg0, %c0_i32 : i32, i32
  }
  func.func @transform_1(%arg0: i32) -> (i32, i32, i32) {
    %c0_i32 = arith.constant 0 : i32
    %c0_i32_0 = arith.constant 0 : i32
    %c0_i32_1 = arith.constant 0 : i32
    %c0_i32_2 = arith.constant 0 : i32
    return %c0_i32, %c0_i32_0, %c0_i32_1 : i32, i32, i32
  }
  func.func @transform_2(%arg0: i32) -> (i32, i32, i32) {
    %c0_i32 = arith.constant 0 : i32
    %c0_i32_0 = arith.constant 0 : i32
    %c0_i32_1 = arith.constant 0 : i32
    %c0_i32_2 = arith.constant 0 : i32
    return %c0_i32, %c0_i32_0, %c0_i32_1 : i32, i32, i32
  }
  func.func @transform_3(%arg0: i32) -> (i32, i32, i32) {
    %c0_i32 = arith.constant 0 : i32
    %c0_i32_0 = arith.constant 0 : i32
    %c0_i32_1 = arith.constant 0 : i32
    %c0_i32_2 = arith.constant 0 : i32
    return %c0_i32, %c0_i32_0, %c0_i32_1 : i32, i32, i32
  }
  func.func @transform_4(%arg0: i32) -> (i32, i32) {
    %c0_i32 = arith.constant 0 : i32
    %c0_i32_0 = arith.constant 0 : i32
    %c0_i32_1 = arith.constant 0 : i32
    return %c0_i32, %c0_i32_0 : i32, i32
  }
  func.func @transform_5(%arg0: i32) -> (i32, i32) {
    %c0_i32 = arith.constant 0 : i32
    %c0_i32_0 = arith.constant 0 : i32
    return %arg0, %c0_i32 : i32, i32
  }
}

</mosaic_0001>

<bundles_post_ra>
// kernel: tpu_custom_call.1
= control target key start
LH: loop header
LB: loop body
LE: loop exit
PB: predicated region body
PF: predicated region fallthrough
CT: control target
= control target key end

     0   :  { %10 = vsyncpa [#allocation4], 0  ;;  %s667_s0 = inlined_call_operand.hbm [shape: f32[16,32], index: 0, kind: input, shape index: {}]   ;;  %s668_s1 = inlined_call_operand.hbm [shape: bf16[1,32,128], index: 1, kind: input, shape index: {}]   ;;  %s669_s2 = inlined_call_operand.hbm [shape: f32[1,1,128], index: 2, kind: input, shape index: {}]   ;;  %s670_s3 = inlined_call_operand.hbm [shape: bf16[1,128,32], index: 3, kind: input, shape index: {}]   ;;  %s671_s4 = inlined_call_operand.hbm [shape: f32[1,32], index: 4, kind: input, shape index: {}]   ;;  %s672_s5 = inlined_call_operand.hbm [shape: f32[16,32], index: 5, kind: output, shape index: {}]  }
   0x1   :  { %11 = vsyncpa [#allocation7], 0 }
   0x2   :  { %12 = vsyncpa [#allocation10], 0 }
   0x3   :  { %13 = vsyncpa [#allocation5], 0  ;;  %s540_s18 = smov [#allocation6]   ;;  %s400_s22 = scalar_lea.hbm %s668_s1, 256 }
   0x4   :  { %s31_s19 = sshll.u32 %s540_s18, 4  ;;  %p401_p0 = scmp.ne.s32.totalorder %s668_s1, %s400_s22  ;;  %s32_s19 = int_to_ptr.vmem [resolvable:$true] %s31_s19 }
   0x5   :  { %p404_p1 = scmp.lt.u32.totalorder %s400_s22, %s668_s1 }
   0x7   :  { %p406_p2 = pnand %p404_p1, %p401_p0 }
   0x9   :  { %409 = shalt.err (!%p406_p2)
}
   0xa   :  { %s410_s27 = scalar_lea.vmem %s32_s19, 256  ;;  %p415_p4 = scmp.lt.s32.totalorder %s32_s19, %s32_s19 }
   0xb   :  { %p411_p3 = scmp.ne.s32.totalorder %s32_s19, %s410_s27  ;;  %p416_p5 = scmp.lt.s32.totalorder %s410_s27, %s410_s27 }
   0xd   :  { %p417_p6 = por %p416_p5, %p415_p4 }
   0xf   :  { %p418_p7 = pnand %p417_p6, %p411_p3 }
  0x11   :  { %421 = shalt.err (!%p418_p7)
}
  0x12   :  { %s541_s28 = smov 64   ;;  %s542_s29 = smov 4  }
  0x13   :  { %37 = dma.hbm_to_vmem [thread:$0]  %s668_s1, 256, %s32_s19, [#allocation7], %s541_s28, %s541_s28, %s542_s29  }
  0x14   :  { %s543_s7 = smov [#allocation9]   ;;  %s544_s9 = smov [#allocation3]  }
  0x15   :  { %s53_s8 = sshll.u32 %s543_s7, 4  ;;  %s19_s10 = sshll.u32 %s544_s9, 4  ;;  %s54_s8 = int_to_ptr.vmem [resolvable:$true] %s53_s8  ;;  %s20_s10 = int_to_ptr.vmem [resolvable:$true] %s19_s10 }
  0x16   :  { %s422_s13 = scalar_lea.hbm %s670_s3, 1024 }
  0x17   :  { %p423_p8 = scmp.ne.s32.totalorder %s670_s3, %s422_s13  ;;  %p426_p9 = scmp.lt.u32.totalorder %s422_s13, %s670_s3 }
  0x19   :  { %p428_p10 = pnand %p426_p9, %p423_p8 }
  0x1b   :  { %431 = shalt.err (!%p428_p10)
}
  0x1c   :  { %s432_s1 = scalar_lea.vmem %s54_s8, 1024  ;;  %p437_p12 = scmp.lt.s32.totalorder %s54_s8, %s54_s8 }
  0x1d   :  { %p433_p11 = scmp.ne.s32.totalorder %s54_s8, %s432_s1  ;;  %p438_p13 = scmp.lt.s32.totalorder %s432_s1, %s432_s1 }
  0x1f   :  { %p439_p0 = por %p438_p13, %p437_p12 }
  0x21   :  { %p440_p1 = pnand %p439_p0, %p433_p11 }
  0x23   :  { %443 = shalt.err (!%p440_p1)
}
  0x24   :  { %59 = dma.hbm_to_vmem [thread:$0]  %s670_s3, 1024, %s54_s8, [#allocation10], %s541_s28, %s541_s28, %s542_s29  }
  0x25   :  { %s444_s22 = scalar_lea.hbm %s667_s0, 256 }
  0x26   :  { %p445_p2 = scmp.ne.s32.totalorder %s667_s0, %s444_s22  ;;  %p448_p3 = scmp.lt.u32.totalorder %s444_s22, %s667_s0 }
  0x28   :  { %p450_p4 = pnand %p448_p3, %p445_p2 }
  0x2a   :  { %453 = shalt.err (!%p450_p4)
}
  0x2b   :  { %s454_s27 = scalar_lea.vmem %s20_s10, 256  ;;  %p459_p6 = scmp.lt.s32.totalorder %s20_s10, %s20_s10 }
  0x2c   :  { %p455_p5 = scmp.ne.s32.totalorder %s20_s10, %s454_s27  ;;  %p460_p7 = scmp.lt.s32.totalorder %s454_s27, %s454_s27 }
  0x2e   :  { %p461_p8 = por %p460_p7, %p459_p6 }
  0x30   :  { %p462_p9 = pnand %p461_p8, %p455_p5 }
  0x32   :  { %465 = shalt.err (!%p462_p9)
}
  0x33   :  { %s545_s3 = smov 128   ;;  %s546_s28 = smov 8  }
  0x34   :  { %25 = dma.hbm_to_vmem [thread:$0]  %s667_s0, 256, %s20_s10, [#allocation4], %s545_s3, %s545_s3, %s546_s28  }
  0x35   :  { %s547_s6 = smov [#allocation8]   ;;  %s548_s8 = smov [#allocation11]  }
  0x36   :  { %s44_s7 = sshll.u32 %s547_s6, 4  ;;  %s66_s9 = sshll.u32 %s548_s8, 4  ;;  %s45_s7 = int_to_ptr.vmem [resolvable:$true] %s44_s7  ;;  %s67_s9 = int_to_ptr.vmem [resolvable:$true] %s66_s9 }
  0x37   :  { %s466_s13 = scalar_lea.hbm %s669_s2, 16 }
  0x38   :  { %p467_p10 = scmp.ne.s32.totalorder %s669_s2, %s466_s13  ;;  %p470_p11 = scmp.lt.u32.totalorder %s466_s13, %s669_s2 }
  0x3a   :  { %p472_p12 = pnand %p470_p11, %p467_p10 }
  0x3c   :  { %475 = shalt.err (!%p472_p12)
}
  0x3d   :  { %s476_s0 = scalar_lea.vmem %s45_s7, 16  ;;  %s480_s10 = scalar_lea.vmem %s45_s7, 32 }
  0x3e   :  { %p477_p13 = scmp.ne.s32.totalorder %s45_s7, %s476_s0  ;;  %p481_p0 = scmp.lt.s32.totalorder %s45_s7, %s45_s7 }
  0x3f   :  { %p482_p1 = scmp.lt.s32.totalorder %s480_s10, %s476_s0 }
  0x41   :  { %p483_p2 = por %p482_p1, %p481_p0 }
  0x43   :  { %p484_p3 = pnand %p483_p2, %p477_p13 }
  0x45   :  { %487 = shalt.err (!%p484_p3)
}
  0x46   :  { %47 = dma.hbm_to_vmem [thread:$0]  %s669_s2, 16, %s45_s7, [#allocation7]  }
  0x47   :  { %s488_s21 = scalar_lea.hbm %s671_s4, 16 }
  0x48   :  { %p489_p4 = scmp.ne.s32.totalorder %s671_s4, %s488_s21  ;;  %p492_p5 = scmp.lt.u32.totalorder %s488_s21, %s671_s4 }
  0x4a   :  { %p494_p6 = pnand %p492_p5, %p489_p4 }
  0x4c   :  { %497 = shalt.err (!%p494_p6)
}
  0x4d   :  { %s498_s26 = scalar_lea.vmem %s67_s9, 16  ;;  %s502_s27 = scalar_lea.vmem %s67_s9, 32 }
  0x4e   :  { %p499_p7 = scmp.ne.s32.totalorder %s67_s9, %s498_s26  ;;  %p503_p8 = scmp.lt.s32.totalorder %s67_s9, %s67_s9 }
  0x4f   :  { %p504_p9 = scmp.lt.s32.totalorder %s502_s27, %s498_s26 }
  0x51   :  { %p505_p10 = por %p504_p9, %p503_p8 }
  0x53   :  { %p506_p11 = pnand %p505_p10, %p499_p7 }
  0x55   :  { %509 = shalt.err (!%p506_p11)
}
  0x56   :  { %69 = dma.hbm_to_vmem [thread:$0]  %s671_s4, 16, %s67_s9, [#allocation10]  }
  0x57   :  { %532 = dma.done.wait [#allocation4], 256  }
  0x58   :  { %533 = vsyncadd [#allocation4], 4294967040 }
  0x59   :  { %534 = dma.done.wait [#allocation7], 272  }
  0x5a   :  { %535 = vsyncadd [#allocation7], 4294967024 }
  0x5b   :  { %536 = dma.done.wait [#allocation10], 1040  }
  0x5c   :  { %537 = vsyncadd [#allocation10], 4294966256  ;;  %vm89_vm0 = vcmask 261120   ;;  %v549_v0 = vmov 0.0   ;;  %vm550_vm1 = vmmov 0   ;;  %v386_v1 = vld [vmem:[#allocation6] sm:$0xff]  }
  0x5d   :  { %346 = vmatprep.subr.bf16.mxu0 %v549_v0  ;;  %350 = vmatprep.mubr.msk.bf16.mxu0 %vm550_vm1, %v549_v0  ;;  %90 = vst.msk [vmem:[#allocation2] sm:$0xff] %vm89_vm0, %v549_v0  ;;  %91 = vst.msk [vmem:[#allocation2 + $0x8] sm:$0xff] %vm89_vm0, %v549_v0  ;;  %v387_v2 = vld [vmem:[#allocation6 + $0x8] sm:$0xff]   ;;  %v86_v3 = vld [vmem:[#allocation3] sm:$0xff]  ;;  %s551_s4 = smov [#allocation12]  }
  0x5e   :  { %354 = vmatprep.subr.bf16.mxu1 %v549_v0  ;;  %370 = vmatprep.mubr.msk.bf16.mxu1 %vm550_vm1, %v549_v0  ;;  %v87_v4 = vld [vmem:[#allocation3 + $0x8] sm:$0xff]  ;;  %v390_v8 = vld [vmem:[#allocation9 + $0x10] sm:$0xff]   ;;  %v391_v9 = vld [vmem:[#allocation9 + $0x18] sm:$0xff]   ;;  %s307_s30 = sshll.u32 %s551_s4, 4  ;;  %s308_s30 = int_to_ptr.vmem [resolvable:$true] %s307_s30 }
  0x5f   :  { %347 = vmatpush3.bf16.msra.mxu0 %v386_v1  ;;  %v88_v5 = vpack.c.bf16 %v87_v4, %v86_v3  ;;  %v388_v6 = vld [vmem:[#allocation9] sm:$0xff]   ;;  %v389_v7 = vld [vmem:[#allocation9 + $0x8] sm:$0xff]   ;;  %v394_v12 = vld [vmem:[#allocation9 + $0x30] sm:$0xff]   ;;  %s510_s6 = scalar_lea.vmem %s308_s30, 256  ;;  %p515_p13 = scmp.lt.s32.totalorder %s308_s30, %s308_s30 }
  0x60   :  { %348 = vmatprep.subr.bf16.mxu0 %v549_v0  ;;  %355 = vmatpush3.bf16.msra.mxu1 %v388_v6  ;;  %v392_v10 = vld [vmem:[#allocation9 + $0x20] sm:$0xff]   ;;  %v393_v11 = vld [vmem:[#allocation9 + $0x28] sm:$0xff]   ;;  %v395_v13 = vld [vmem:[#allocation9 + $0x38] sm:$0xff]   ;;  %p511_p12 = scmp.ne.s32.totalorder %s308_s30, %s510_s6  ;;  %p516_p0 = scmp.lt.s32.totalorder %s510_s6, %s510_s6 }
  0x61   :  { %356 = vmatprep.subr.bf16.mxu1 %v549_v0  ;;  %v321_v14 = vld [vmem:[#allocation8] ss:$0 sm:$0xff]  ;;  %v333_v48 = vld [vmem:[#allocation11] ss:$0 sm:$0xff] }
  0x62   :  { %p517_p1 = por %p516_p0, %p515_p13 }
  0x63   :  { %349 = vmatpush3.bf16.msra.mxu0 %v387_v2 }
  0x64   :  { %357 = vmatpush3.bf16.msra.mxu1 %v389_v7  ;;  %v177_v40 = vld [vmem:[#allocation2] sm:$0xff]  ;;  %v178_v42 = vld [vmem:[#allocation2 + $0x8] sm:$0xff]  ;;  %p518_p2 = pnand %p517_p1, %p511_p12 }
  0x65   :  { %358 = vmatprep.subr.bf16.mxu1 %v549_v0 }
  0x66   :  { %351 = vmatmul.mubr.msk.bf16.vlgmr.msra.gmra.mrb[0].mxu0 %vm89_vm0, %v88_v5 }
  0x68   :  { %359 = vmatpush3.bf16.msra.mxu1 %v390_v8 }
  0x69   :  { %360 = vmatprep.subr.bf16.mxu1 %v549_v0 }
  0x6c   :  { %361 = vmatpush3.bf16.msra.mxu1 %v391_v9 }
  0x6d   :  { %362 = vmatprep.subr.bf16.mxu1 %v549_v0 }
  0x70   :  { %363 = vmatpush3.bf16.msra.mxu1 %v392_v10 }
  0x71   :  { %364 = vmatprep.subr.bf16.mxu1 %v549_v0 }
  0x74   :  { %365 = vmatpush3.bf16.msra.mxu1 %v393_v11 }
  0x75   :  { %366 = vmatprep.subr.bf16.mxu1 %v549_v0 }
  0x78   :  { %367 = vmatpush3.bf16.msra.mxu1 %v394_v12 }
  0x79   :  { %368 = vmatprep.subr.bf16.mxu1 %v549_v0 }
  0x7c   :  { %369 = vmatpush3.bf16.msra.mxu1 %v395_v13 }
 0x139   :  { %v152_v15 = vpop.f32.mrb[0].mxu0 }
 0x13a   :  { %v153_v16 = vadd.f32 %v321_v14, %v152_v15  ;;  %v352_v17 = vpop.f32.mrb[1].mxu0 }
 0x13b   :  { %v155_v18 = vpop.f32.mrb[2].mxu0 }
 0x13c   :  { %v161_v19 = vmul.f32 0.044715, %v153_v16  ;;  %v156_v20 = vadd.f32 %v321_v14, %v155_v18  ;;  %v353_v21 = vpop.f32.mrb[3].mxu0  ;;  %v159_v34 = vmul.f32 0.5, %v153_v16 }
 0x13e   :  { %v163_v22 = vmul.f32 %v161_v19, %v153_v16  ;;  %v162_v23 = vmul.f32 0.044715, %v156_v20  ;;  %v160_v35 = vmul.f32 0.5, %v156_v20 }
 0x140   :  { %v165_v24 = vmul.f32 %v163_v22, %v153_v16  ;;  %v164_v25 = vmul.f32 %v162_v23, %v156_v20 }
 0x142   :  { %v166_v26 = vmul.f32 %v164_v25, %v156_v20  ;;  %v167_v27 = vadd.f32 %v165_v24, %v153_v16 }
 0x144   :  { %v168_v28 = vadd.f32 %v166_v26, %v156_v20  ;;  %v169_v29 = vmul.f32 0.7978846, %v167_v27 }
 0x146   :  { %v170_v30 = vmul.f32 0.7978846, %v168_v28  ;;  %396 = vtanh.f32 %v169_v29 }
 0x148   :  { %398 = vtanh.f32 %v170_v30 }
 0x150   :  { %v397_v31 = vpop.eup %396 }
 0x151   :  { %v173_v32 = vadd.f32 1.0, %v397_v31 }
 0x152   :  { %v399_v33 = vpop.eup %398 }
 0x153   :  { %v174_v36 = vadd.f32 1.0, %v399_v33  ;;  %v175_v37 = vmul.f32 %v173_v32, %v159_v34 }
 0x155   :  { %v176_v38 = vmul.f32 %v174_v36, %v160_v35 }
 0x157   :  { %v179_v39 = vpack.c.bf16 %v176_v38, %v175_v37 }
 0x159   :  { %371 = vmatmul.mubr.bf16.vlgmr.msra.gmra.mrb[0].mxu1 %v179_v39 }
 0x22c   :  { %v278_v41 = vpop.f32.mrb[0].mxu1 }
 0x22d   :  { %v285_v43 = vadd.f32 %v278_v41, %v177_v40  ;;  %v372_v44 = vpop.f32.mrb[1].mxu1 }
 0x22e   :  { %v281_v45 = vpop.f32.mrb[2].mxu1 }
 0x22f   :  { %287 = vst.msk [vmem:[#allocation2] sm:$0xff] %vm89_vm0, %v285_v43  ;;  %v286_v46 = vadd.f32 %v281_v45, %v178_v42  ;;  %v373_v47 = vpop.f32.mrb[3].mxu1 }
 0x231   :  { %288 = vst.msk [vmem:[#allocation2 + $0x8] sm:$0xff] %vm89_vm0, %v286_v46 }
 0x236   :  { %v289_v49 = vld [vmem:[#allocation2] sm:$0xff] }
 0x237   :  { %v298_v50 = vadd.f32 %v333_v48, %v289_v49 }
 0x238   :  { %v290_v51 = vld [vmem:[#allocation2 + $0x8] sm:$0xff] }
 0x239   :  { %v299_v52 = vadd.f32 %v333_v48, %v290_v51  ;;  %300 = vst.msk [vmem:[#allocation12] sm:$0xff] %vm89_vm0, %v298_v50 }
 0x23b   :  { %301 = vst.msk [vmem:[#allocation12 + $0x8] sm:$0xff] %vm89_vm0, %v299_v52 }
 0x23c   :  { %521 = shalt.err (!%p518_p2)
}
 0x23d   :  { %s522_s9 = scalar_lea.hbm %s672_s5, 256 }
 0x23e   :  { %p523_p3 = scmp.ne.s32.totalorder %s672_s5, %s522_s9  ;;  %p526_p4 = scmp.lt.u32.totalorder %s522_s9, %s672_s5 }
 0x240   :  { %p528_p5 = pnand %p526_p4, %p523_p3 }
 0x242   :  { %531 = shalt.err (!%p528_p5)
}
 0x243   :  { %313 = dma.vmem_to_hbm [thread:$0]  %s308_s30, 256, %s672_s5, [#allocation5], %s545_s3, %s545_s3, %s546_s28  }
 0x244   :  { %538 = dma.done.wait [#allocation5], 256  }
 0x245   :  { %539 = vsyncadd [#allocation5], 4294967040 }
 0x246   :  { %317 = vsyncpa [#allocation4], 1 }
 0x247   :  { %318 = vsyncpa [#allocation7], 1 }
 0x248   :  { %319 = vsyncpa [#allocation10], 1 }
 0x249   :  { %320 = vsyncpa [#allocation5], 1 }

// kernel: tpu_custom_call.1
= control target key start
LH: loop header
LB: loop body
LE: loop exit
PB: predicated region body
PF: predicated region fallthrough
CT: control target
= control target key end

     0   :  { %10 = vsyncpa [#allocation4], 0  ;;  %s667_s0 = inlined_call_operand.hbm [shape: f32[16,32], index: 0, kind: input, shape index: {}]   ;;  %s668_s1 = inlined_call_operand.hbm [shape: bf16[1,32,128], index: 1, kind: input, shape index: {}]   ;;  %s669_s2 = inlined_call_operand.hbm [shape: f32[1,1,128], index: 2, kind: input, shape index: {}]   ;;  %s670_s3 = inlined_call_operand.hbm [shape: bf16[1,128,32], index: 3, kind: input, shape index: {}]   ;;  %s671_s4 = inlined_call_operand.hbm [shape: f32[1,32], index: 4, kind: input, shape index: {}]   ;;  %s672_s5 = inlined_call_operand.hbm [shape: f32[16,32], index: 5, kind: output, shape index: {}]  }
   0x1   :  { %11 = vsyncpa [#allocation7], 0 }
   0x2   :  { %12 = vsyncpa [#allocation10], 0 }
   0x3   :  { %13 = vsyncpa [#allocation5], 0  ;;  %s540_s18 = smov [#allocation6]   ;;  %s400_s22 = scalar_lea.hbm %s668_s1, 256 }
   0x4   :  { %s31_s19 = sshll.u32 %s540_s18, 4  ;;  %p401_p0 = scmp.ne.s32.totalorder %s668_s1, %s400_s22  ;;  %s32_s19 = int_to_ptr.vmem [resolvable:$true] %s31_s19 }
   0x5   :  { %p404_p1 = scmp.lt.u32.totalorder %s400_s22, %s668_s1 }
   0x7   :  { %p406_p2 = pnand %p404_p1, %p401_p0 }
   0x9   :  { %409 = shalt.err (!%p406_p2)
}
   0xa   :  { %s410_s27 = scalar_lea.vmem %s32_s19, 256  ;;  %p415_p4 = scmp.lt.s32.totalorder %s32_s19, %s32_s19 }
   0xb   :  { %p411_p3 = scmp.ne.s32.totalorder %s32_s19, %s410_s27  ;;  %p416_p5 = scmp.lt.s32.totalorder %s410_s27, %s410_s27 }
   0xd   :  { %p417_p6 = por %p416_p5, %p415_p4 }
   0xf   :  { %p418_p7 = pnand %p417_p6, %p411_p3 }
  0x11   :  { %421 = shalt.err (!%p418_p7)
}
  0x12   :  { %s541_s28 = smov 64   ;;  %s542_s29 = smov 4  }
  0x13   :  { %37 = dma.hbm_to_vmem [thread:$0]  %s668_s1, 256, %s32_s19, [#allocation7], %s541_s28, %s541_s28, %s542_s29  }
  0x14   :  { %s543_s7 = smov [#allocation9]   ;;  %s544_s9 = smov [#allocation3]  }
  0x15   :  { %s53_s8 = sshll.u32 %s543_s7, 4  ;;  %s19_s10 = sshll.u32 %s544_s9, 4  ;;  %s54_s8 = int_to_ptr.vmem [resolvable:$true] %s53_s8  ;;  %s20_s10 = int_to_ptr.vmem [resolvable:$true] %s19_s10 }
  0x16   :  { %s422_s13 = scalar_lea.hbm %s670_s3, 1024 }
  0x17   :  { %p423_p8 = scmp.ne.s32.totalorder %s670_s3, %s422_s13  ;;  %p426_p9 = scmp.lt.u32.totalorder %s422_s13, %s670_s3 }
  0x19   :  { %p428_p10 = pnand %p426_p9, %p423_p8 }
  0x1b   :  { %431 = shalt.err (!%p428_p10)
}
  0x1c   :  { %s432_s1 = scalar_lea.vmem %s54_s8, 1024  ;;  %p437_p12 = scmp.lt.s32.totalorder %s54_s8, %s54_s8 }
  0x1d   :  { %p433_p11 = scmp.ne.s32.totalorder %s54_s8, %s432_s1  ;;  %p438_p13 = scmp.lt.s32.totalorder %s432_s1, %s432_s1 }
  0x1f   :  { %p439_p0 = por %p438_p13, %p437_p12 }
  0x21   :  { %p440_p1 = pnand %p439_p0, %p433_p11 }
  0x23   :  { %443 = shalt.err (!%p440_p1)
}
  0x24   :  { %59 = dma.hbm_to_vmem [thread:$0]  %s670_s3, 1024, %s54_s8, [#allocation10], %s541_s28, %s541_s28, %s542_s29  }
  0x25   :  { %s444_s22 = scalar_lea.hbm %s667_s0, 256 }
  0x26   :  { %p445_p2 = scmp.ne.s32.totalorder %s667_s0, %s444_s22  ;;  %p448_p3 = scmp.lt.u32.totalorder %s444_s22, %s667_s0 }
  0x28   :  { %p450_p4 = pnand %p448_p3, %p445_p2 }
  0x2a   :  { %453 = shalt.err (!%p450_p4)
}
  0x2b   :  { %s454_s27 = scalar_lea.vmem %s20_s10, 256  ;;  %p459_p6 = scmp.lt.s32.totalorder %s20_s10, %s20_s10 }
  0x2c   :  { %p455_p5 = scmp.ne.s32.totalorder %s20_s10, %s454_s27  ;;  %p460_p7 = scmp.lt.s32.totalorder %s454_s27, %s454_s27 }
  0x2e   :  { %p461_p8 = por %p460_p7, %p459_p6 }
  0x30   :  { %p462_p9 = pnand %p461_p8, %p455_p5 }
  0x32   :  { %465 = shalt.err (!%p462_p9)
}
  0x33   :  { %s545_s3 = smov 128   ;;  %s546_s28 = smov 8  }
  0x34   :  { %25 = dma.hbm_to_vmem [thread:$0]  %s667_s0, 256, %s20_s10, [#allocation4], %s545_s3, %s545_s3, %s546_s28  }
  0x35   :  { %s547_s6 = smov [#allocation8]   ;;  %s548_s8 = smov [#allocation11]  }
  0x36   :  { %s44_s7 = sshll.u32 %s547_s6, 4  ;;  %s66_s9 = sshll.u32 %s548_s8, 4  ;;  %s45_s7 = int_to_ptr.vmem [resolvable:$true] %s44_s7  ;;  %s67_s9 = int_to_ptr.vmem [resolvable:$true] %s66_s9 }
  0x37   :  { %s466_s13 = scalar_lea.hbm %s669_s2, 16 }
  0x38   :  { %p467_p10 = scmp.ne.s32.totalorder %s669_s2, %s466_s13  ;;  %p470_p11 = scmp.lt.u32.totalorder %s466_s13, %s669_s2 }
  0x3a   :  { %p472_p12 = pnand %p470_p11, %p467_p10 }
  0x3c   :  { %475 = shalt.err (!%p472_p12)
}
  0x3d   :  { %s476_s0 = scalar_lea.vmem %s45_s7, 16  ;;  %s480_s10 = scalar_lea.vmem %s45_s7, 32 }
  0x3e   :  { %p477_p13 = scmp.ne.s32.totalorder %s45_s7, %s476_s0  ;;  %p481_p0 = scmp.lt.s32.totalorder %s45_s7, %s45_s7 }
  0x3f   :  { %p482_p1 = scmp.lt.s32.totalorder %s480_s10, %s476_s0 }
  0x41   :  { %p483_p2 = por %p482_p1, %p481_p0 }
  0x43   :  { %p484_p3 = pnand %p483_p2, %p477_p13 }
  0x45   :  { %487 = shalt.err (!%p484_p3)
}
  0x46   :  { %47 = dma.hbm_to_vmem [thread:$0]  %s669_s2, 16, %s45_s7, [#allocation7]  }
  0x47   :  { %s488_s21 = scalar_lea.hbm %s671_s4, 16 }
  0x48   :  { %p489_p4 = scmp.ne.s32.totalorder %s671_s4, %s488_s21  ;;  %p492_p5 = scmp.lt.u32.totalorder %s488_s21, %s671_s4 }
  0x4a   :  { %p494_p6 = pnand %p492_p5, %p489_p4 }
  0x4c   :  { %497 = shalt.err (!%p494_p6)
}
  0x4d   :  { %s498_s26 = scalar_lea.vmem %s67_s9, 16  ;;  %s502_s27 = scalar_lea.vmem %s67_s9, 32 }
  0x4e   :  { %p499_p7 = scmp.ne.s32.totalorder %s67_s9, %s498_s26  ;;  %p503_p8 = scmp.lt.s32.totalorder %s67_s9, %s67_s9 }
  0x4f   :  { %p504_p9 = scmp.lt.s32.totalorder %s502_s27, %s498_s26 }
  0x51   :  { %p505_p10 = por %p504_p9, %p503_p8 }
  0x53   :  { %p506_p11 = pnand %p505_p10, %p499_p7 }
  0x55   :  { %509 = shalt.err (!%p506_p11)
}
  0x56   :  { %69 = dma.hbm_to_vmem [thread:$0]  %s671_s4, 16, %s67_s9, [#allocation10]  }
  0x57   :  { %532 = dma.done.wait [#allocation4], 256  }
  0x58   :  { %533 = vsyncadd [#allocation4], 4294967040 }
  0x59   :  { %534 = dma.done.wait [#allocation7], 272  }
  0x5a   :  { %535 = vsyncadd [#allocation7], 4294967024 }
  0x5b   :  { %536 = dma.done.wait [#allocation10], 1040  }
  0x5c   :  { %537 = vsyncadd [#allocation10], 4294966256  ;;  %vm89_vm0 = vcmask 261120   ;;  %v549_v0 = vmov 0.0   ;;  %vm550_vm1 = vmmov 0   ;;  %v386_v1 = vld [vmem:[#allocation6] sm:$0xff]  }
  0x5d   :  { %346 = vmatprep.subr.bf16.mxu0 %v549_v0  ;;  %350 = vmatprep.mubr.msk.bf16.mxu0 %vm550_vm1, %v549_v0  ;;  %90 = vst.msk [vmem:[#allocation2] sm:$0xff] %vm89_vm0, %v549_v0  ;;  %91 = vst.msk [vmem:[#allocation2 + $0x8] sm:$0xff] %vm89_vm0, %v549_v0  ;;  %v387_v2 = vld [vmem:[#allocation6 + $0x8] sm:$0xff]   ;;  %v86_v3 = vld [vmem:[#allocation3] sm:$0xff]  ;;  %s551_s4 = smov [#allocation12]  }
  0x5e   :  { %354 = vmatprep.subr.bf16.mxu1 %v549_v0  ;;  %370 = vmatprep.mubr.msk.bf16.mxu1 %vm550_vm1, %v549_v0  ;;  %v87_v4 = vld [vmem:[#allocation3 + $0x8] sm:$0xff]  ;;  %v390_v8 = vld [vmem:[#allocation9 + $0x10] sm:$0xff]   ;;  %v391_v9 = vld [vmem:[#allocation9 + $0x18] sm:$0xff]   ;;  %s307_s30 = sshll.u32 %s551_s4, 4  ;;  %s308_s30 = int_to_ptr.vmem [resolvable:$true] %s307_s30 }
  0x5f   :  { %347 = vmatpush3.bf16.msra.mxu0 %v386_v1  ;;  %v88_v5 = vpack.c.bf16 %v87_v4, %v86_v3  ;;  %v388_v6 = vld [vmem:[#allocation9] sm:$0xff]   ;;  %v389_v7 = vld [vmem:[#allocation9 + $0x8] sm:$0xff]   ;;  %v394_v12 = vld [vmem:[#allocation9 + $0x30] sm:$0xff]   ;;  %s510_s6 = scalar_lea.vmem %s308_s30, 256  ;;  %p515_p13 = scmp.lt.s32.totalorder %s308_s30, %s308_s30 }
  0x60   :  { %348 = vmatprep.subr.bf16.mxu0 %v549_v0  ;;  %355 = vmatpush3.bf16.msra.mxu1 %v388_v6  ;;  %v392_v10 = vld [vmem:[#allocation9 + $0x20] sm:$0xff]   ;;  %v393_v11 = vld [vmem:[#allocation9 + $0x28] sm:$0xff]   ;;  %v395_v13 = vld [vmem:[#allocation9 + $0x38] sm:$0xff]   ;;  %p511_p12 = scmp.ne.s32.totalorder %s308_s30, %s510_s6  ;;  %p516_p0 = scmp.lt.s32.totalorder %s510_s6, %s510_s6 }
  0x61   :  { %356 = vmatprep.subr.bf16.mxu1 %v549_v0  ;;  %v321_v14 = vld [vmem:[#allocation8] ss:$0 sm:$0xff]  ;;  %v333_v48 = vld [vmem:[#allocation11] ss:$0 sm:$0xff] }
  0x62   :  { %p517_p1 = por %p516_p0, %p515_p13 }
  0x63   :  { %349 = vmatpush3.bf16.msra.mxu0 %v387_v2 }
  0x64   :  { %357 = vmatpush3.bf16.msra.mxu1 %v389_v7  ;;  %v177_v40 = vld [vmem:[#allocation2] sm:$0xff]  ;;  %v178_v42 = vld [vmem:[#allocation2 + $0x8] sm:$0xff]  ;;  %p518_p2 = pnand %p517_p1, %p511_p12 }
  0x65   :  { %358 = vmatprep.subr.bf16.mxu1 %v549_v0 }
  0x66   :  { %351 = vmatmul.mubr.msk.bf16.vlgmr.msra.gmra.mrb[0].mxu0 %vm89_vm0, %v88_v5 }
  0x68   :  { %359 = vmatpush3.bf16.msra.mxu1 %v390_v8 }
  0x69   :  { %360 = vmatprep.subr.bf16.mxu1 %v549_v0 }
  0x6c   :  { %361 = vmatpush3.bf16.msra.mxu1 %v391_v9 }
  0x6d   :  { %362 = vmatprep.subr.bf16.mxu1 %v549_v0 }
  0x70   :  { %363 = vmatpush3.bf16.msra.mxu1 %v392_v10 }
  0x71   :  { %364 = vmatprep.subr.bf16.mxu1 %v549_v0 }
  0x74   :  { %365 = vmatpush3.bf16.msra.mxu1 %v393_v11 }
  0x75   :  { %366 = vmatprep.subr.bf16.mxu1 %v549_v0 }
  0x78   :  { %367 = vmatpush3.bf16.msra.mxu1 %v394_v12 }
  0x79   :  { %368 = vmatprep.subr.bf16.mxu1 %v549_v0 }
  0x7c   :  { %369 = vmatpush3.bf16.msra.mxu1 %v395_v13 }
 0x139   :  { %v152_v15 = vpop.f32.mrb[0].mxu0 }
 0x13a   :  { %v153_v16 = vadd.f32 %v321_v14, %v152_v15  ;;  %v352_v17 = vpop.f32.mrb[1].mxu0 }
 0x13b   :  { %v155_v18 = vpop.f32.mrb[2].mxu0 }
 0x13c   :  { %v161_v19 = vmul.f32 0.044715, %v153_v16  ;;  %v156_v20 = vadd.f32 %v321_v14, %v155_v18  ;;  %v353_v21 = vpop.f32.mrb[3].mxu0  ;;  %v159_v34 = vmul.f32 0.5, %v153_v16 }
 0x13e   :  { %v163_v22 = vmul.f32 %v161_v19, %v153_v16  ;;  %v162_v23 = vmul.f32 0.044715, %v156_v20  ;;  %v160_v35 = vmul.f32 0.5, %v156_v20 }
 0x140   :  { %v165_v24 = vmul.f32 %v163_v22, %v153_v16  ;;  %v164_v25 = vmul.f32 %v162_v23, %v156_v20 }
 0x142   :  { %v166_v26 = vmul.f32 %v164_v25, %v156_v20  ;;  %v167_v27 = vadd.f32 %v165_v24, %v153_v16 }
 0x144   :  { %v168_v28 = vadd.f32 %v166_v26, %v156_v20  ;;  %v169_v29 = vmul.f32 0.7978846, %v167_v27 }
 0x146   :  { %v170_v30 = vmul.f32 0.7978846, %v168_v28  ;;  %396 = vtanh.f32 %v169_v29 }
 0x148   :  { %398 = vtanh.f32 %v170_v30 }
 0x150   :  { %v397_v31 = vpop.eup %396 }
 0x151   :  { %v173_v32 = vadd.f32 1.0, %v397_v31 }
 0x152   :  { %v399_v33 = vpop.eup %398 }
 0x153   :  { %v174_v36 = vadd.f32 1.0, %v399_v33  ;;  %v175_v37 = vmul.f32 %v173_v32, %v159_v34 }
 0x155   :  { %v176_v38 = vmul.f32 %v174_v36, %v160_v35 }
 0x157   :  { %v179_v39 = vpack.c.bf16 %v176_v38, %v175_v37 }
 0x159   :  { %371 = vmatmul.mubr.bf16.vlgmr.msra.gmra.mrb[0].mxu1 %v179_v39 }
 0x22c   :  { %v278_v41 = vpop.f32.mrb[0].mxu1 }
 0x22d   :  { %v285_v43 = vadd.f32 %v278_v41, %v177_v40  ;;  %v372_v44 = vpop.f32.mrb[1].mxu1 }
 0x22e   :  { %v281_v45 = vpop.f32.mrb[2].mxu1 }
 0x22f   :  { %287 = vst.msk [vmem:[#allocation2] sm:$0xff] %vm89_vm0, %v285_v43  ;;  %v286_v46 = vadd.f32 %v281_v45, %v178_v42  ;;  %v373_v47 = vpop.f32.mrb[3].mxu1 }
 0x231   :  { %288 = vst.msk [vmem:[#allocation2 + $0x8] sm:$0xff] %vm89_vm0, %v286_v46 }
 0x236   :  { %v289_v49 = vld [vmem:[#allocation2] sm:$0xff] }
 0x237   :  { %v298_v50 = vadd.f32 %v333_v48, %v289_v49 }
 0x238   :  { %v290_v51 = vld [vmem:[#allocation2 + $0x8] sm:$0xff] }
 0x239   :  { %v299_v52 = vadd.f32 %v333_v48, %v290_v51  ;;  %300 = vst.msk [vmem:[#allocation12] sm:$0xff] %vm89_vm0, %v298_v50 }
 0x23b   :  { %301 = vst.msk [vmem:[#allocation12 + $0x8] sm:$0xff] %vm89_vm0, %v299_v52 }
 0x23c   :  { %521 = shalt.err (!%p518_p2)
}
 0x23d   :  { %s522_s9 = scalar_lea.hbm %s672_s5, 256 }
 0x23e   :  { %p523_p3 = scmp.ne.s32.totalorder %s672_s5, %s522_s9  ;;  %p526_p4 = scmp.lt.u32.totalorder %s522_s9, %s672_s5 }
 0x240   :  { %p528_p5 = pnand %p526_p4, %p523_p3 }
 0x242   :  { %531 = shalt.err (!%p528_p5)
}
 0x243   :  { %313 = dma.vmem_to_hbm [thread:$0]  %s308_s30, 256, %s672_s5, [#allocation5], %s545_s3, %s545_s3, %s546_s28  }
 0x244   :  { %538 = dma.done.wait [#allocation5], 256  }
 0x245   :  { %539 = vsyncadd [#allocation5], 4294967040 }
 0x246   :  { %317 = vsyncpa [#allocation4], 1 }
 0x247   :  { %318 = vsyncpa [#allocation7], 1 }
 0x248   :  { %319 = vsyncpa [#allocation10], 1 }
 0x249   :  { %320 = vsyncpa [#allocation5], 1 }

</bundles_post_ra>
